<compile_context>
chip_gen: v5e
topology: v5e:2x2
jax: 0.10.0
libtpu: 0.0.40
codegen_flags: <defaults>
</compile_context>

<pallas_src>
import functools

import jax
import jax.numpy as jnp
from jax.experimental import pallas as pl
from jax.experimental.pallas import tpu as pltpu

IN_F, HID, OUT_F = 40, 256, 10
OUT_PAD = 128            # lane-dense output width (>= OUT_F, multiple of 128)
BN_EPS = 1e-5


def apply_kernel(x_ref, w1_ref, scale_ref, shift_ref, w2_ref, b2_ref, o_ref):
    """One batch tile: Linear1 -> (precomputed) BN affine + ReLU -> Linear2."""
    # b1 intentionally omitted: cancelled exactly by training-mode BN.
    h = jnp.dot(x_ref[...], w1_ref[...], preferred_element_type=jnp.float32)
    # Fused BN affine + ReLU: one scale/shift + max over the [tile_b, 256] tile.
    hn = jnp.maximum(h * scale_ref[...] + shift_ref[...], 0.0)
    # Second Linear into a lane-dense (128-wide, zero-padded) output slab.
    o_ref[...] = jnp.dot(hn, w2_ref[...],
                         preferred_element_type=jnp.float32) + b2_ref[...]


def meta_stacking_head(x, w1, b1, gamma, beta, w2, b2, *, tile_b=None):
    """Forward pass of MetaStackingHead (training-mode BatchNorm).

    b1 is accepted for interface parity with the PyTorch module but unused:
    it is exactly cancelled by the batch-mean subtraction of training-mode BN
    (and batch variance is shift-invariant).
    """
    del b1
    B = x.shape[0]
    x = x.astype(jnp.float32)
    w1 = w1.astype(jnp.float32)
    gamma = gamma.reshape(1, HID).astype(jnp.float32)
    beta = beta.reshape(1, HID).astype(jnp.float32)
    w2 = w2.reshape(HID, OUT_F).astype(jnp.float32)
    b2 = b2.reshape(1, OUT_F).astype(jnp.float32)

    # ---- Batch statistics via the Gram trick (tiny XLA ops, one read of x) ----
    #   sum_i h_ij            = (colsum(x) @ W1)_j
    #   sum_i h_ij^2          = (W1^T (x^T x) W1)_{jj}
    # NOTE: single-pass variance E[h^2]-E[h]^2; fine for well-scaled inputs,
    # HIGHEST precision used for the tiny matmuls to limit cancellation.
    hp = jax.lax.Precision.HIGHEST
    colsum = jnp.sum(x, axis=0, keepdims=True)                        # [1, 40]
    gram = jnp.dot(x.T, x, precision=hp)                              # [40, 40]
    sum_h = jnp.dot(colsum, w1, precision=hp)                         # [1, 256]
    sumsq_h = jnp.sum(jnp.dot(gram, w1, precision=hp) * w1,
                      axis=0, keepdims=True)                          # [1, 256]
    inv_b = 1.0 / B                                                   # static
    mean = sum_h * inv_b
    var = jnp.maximum(sumsq_h * inv_b - mean * mean, 0.0)
    scale = gamma * jax.lax.rsqrt(var + BN_EPS)                       # [1, 256]
    shift = beta - mean * scale                                       # [1, 256]

    # ---- Tiling ----
    if tile_b is None:
        # ~7 MiB working set at 2048 rows: fits v5e/v6e (128 MiB) and v7x (64 MiB).
        tile_b = min(2048, ((B + 7) // 8) * 8)
    tile_b = max(8, ((tile_b + 7) // 8) * 8)       # sublane-aligned
    n_tiles = pl.cdiv(B, tile_b)
    b_pad = n_tiles * tile_b

    # Lane-dense output: pad second Linear to 128 lanes -> unmasked stores.
    w2p = jnp.zeros((HID, OUT_PAD), jnp.float32).at[:, :OUT_F].set(w2)
    b2p = jnp.zeros((1, OUT_PAD), jnp.float32).at[:, :OUT_F].set(b2)

    # Constant-index-map params: single-buffered (no wasted second VMEM copy).
    resident = lambda shape: pl.BlockSpec(shape, lambda i: (0, 0),
                                          pipeline_mode=pl.Buffered(1))

    flops = 2 * b_pad * (IN_F * HID + HID * OUT_PAD)
    bytes_accessed = 4 * (b_pad * IN_F + IN_F * HID + 2 * HID
                          + HID * OUT_PAD + OUT_PAD + b_pad * OUT_PAD)

    out = pl.pallas_call(
        apply_kernel,
        out_shape=jax.ShapeDtypeStruct((b_pad, OUT_PAD), jnp.float32),
        grid_spec=pltpu.PrefetchScalarGridSpec(
            num_scalar_prefetch=0,
            grid=(n_tiles,),                              # batch tiles only
            in_specs=[
                pl.BlockSpec((tile_b, IN_F), lambda i: (i, 0)),   # x tile
                resident((IN_F, HID)),                            # W1
                resident((1, HID)),                               # scale
                resident((1, HID)),                               # shift
                resident((HID, OUT_PAD)),                         # W2 (padded)
                resident((1, OUT_PAD)),                           # b2 (padded)
            ],
            out_specs=pl.BlockSpec((tile_b, OUT_PAD), lambda i: (i, 0)),
        ),
        compiler_params=pltpu.CompilerParams(
            # Tiles are fully independent now -> megacore-shard on v7x.
            dimension_semantics=("parallel",),
            vmem_limit_bytes=32 * 1024 * 1024,
        ),
        cost_estimate=pl.CostEstimate(flops=flops, transcendentals=0,
                                      bytes_accessed=bytes_accessed),
    )(x, w1, scale, shift, w2p, b2p)
    return out[:B, :OUT_F]


def init_params(key):
    """Deterministic init mimicking PyTorch defaults (Linear: U(+-1/sqrt(fan_in)),
    BatchNorm1d: gamma=1, beta=0)."""
    k1, k2, k3, k4 = jax.random.split(key, 4)
    bound1 = 1.0 / jnp.sqrt(IN_F)
    bound2 = 1.0 / jnp.sqrt(HID)
    w1 = jax.random.uniform(k1, (IN_F, HID), jnp.float32, -bound1, bound1)
    b1 = jax.random.uniform(k2, (1, HID), jnp.float32, -bound1, bound1)
    w2 = jax.random.uniform(k3, (HID, OUT_F), jnp.float32, -bound2, bound2)
    b2 = jax.random.uniform(k4, (1, OUT_F), jnp.float32, -bound2, bound2)
    gamma = jnp.ones((1, HID), jnp.float32)
    beta = jnp.zeros((1, HID), jnp.float32)
    return w1, b1, gamma, beta, w2, b2


def reference(x, w1, b1, gamma, beta, w2, b2):
    """Pure-JAX reference: Linear -> training-mode BatchNorm1d -> ReLU -> Linear."""
    hp = jax.lax.Precision.HIGHEST
    h = jnp.dot(x, w1, precision=hp) + b1          # reference keeps b1
    mean = jnp.mean(h, axis=0, keepdims=True)
    var = jnp.mean((h - mean) ** 2, axis=0, keepdims=True)
    h = (h - mean) / jnp.sqrt(var + BN_EPS) * gamma + beta
    h = jnp.maximum(h, 0.0)
    return jnp.dot(h, w2, precision=hp) + b2


if __name__ == "__main__":
    key = jax.random.PRNGKey(0)
    kx, kx2, kp = jax.random.split(key, 3)

    params = init_params(kp)

    # Path 1: default tiling (single batch tile).
    B = 40
    x = jax.random.normal(kx, (B, IN_F), jnp.float32)
    ref = reference(x, *params)
    out1 = jax.block_until_ready(meta_stacking_head(x, *params))
    assert out1.shape == (B, OUT_F)
    assert jnp.allclose(out1, ref, atol=2e-4, rtol=2e-4), (
        f"single-tile mismatch: {jnp.max(jnp.abs(out1 - ref))}")

    # Path 2: multi-tile path with a ragged last tile (40 = 16 + 16 + 8).
    out2 = jax.block_until_ready(meta_stacking_head(x, *params, tile_b=16))
    assert out2.shape == (B, OUT_F)
    assert jnp.allclose(out2, ref, atol=2e-4, rtol=2e-4), (
        f"multi-tile mismatch: {jnp.max(jnp.abs(out2 - ref))}")

    # Path 3: B neither a multiple of tile_b nor of 8 (explicit ragged-row test).
    B3 = 37
    x3 = jax.random.normal(kx2, (B3, IN_F), jnp.float32)
    ref3 = reference(x3, *params)
    out3 = jax.block_until_ready(meta_stacking_head(x3, *params, tile_b=16))
    assert out3.shape == (B3, OUT_F)
    assert jnp.allclose(out3, ref3, atol=2e-4, rtol=2e-4), (
        f"ragged-batch mismatch: {jnp.max(jnp.abs(out3 - ref3))}")

    print("KERNEL_OK")
</pallas_src>

<mosaic_0001>
module attributes {stable_mosaic.version = 11 : i64} {
  func.func @apply_kernel(%arg0: i32, %arg1: memref<40x40xf32, #tpu.memory_space<vmem>>, %arg2: memref<40x256xf32, #tpu.memory_space<vmem>>, %arg3: memref<1x256xf32, #tpu.memory_space<vmem>>, %arg4: memref<1x256xf32, #tpu.memory_space<vmem>>, %arg5: memref<256x128xf32, #tpu.memory_space<vmem>>, %arg6: memref<1x128xf32, #tpu.memory_space<vmem>>, %arg7: memref<40x128xf32, #tpu.memory_space<vmem>>) attributes {dimension_semantics = [#tpu.dimension_semantics<parallel>], iteration_bounds = array<i64: 1>, scalar_prefetch = 0 : i64, scratch_operands = 0 : i64, tpu.core_type = #tpu.core_type<tc>, window_params = [{transform_indices = @transform_0, window_bounds = array<i64: 40, 40>}, {pipeline_mode = #tpu.pipeline_mode<synchronous>, transform_indices = @transform_1, window_bounds = array<i64: 40, 256>}, {pipeline_mode = #tpu.pipeline_mode<synchronous>, transform_indices = @transform_2, window_bounds = array<i64: 1, 256>}, {pipeline_mode = #tpu.pipeline_mode<synchronous>, transform_indices = @transform_3, window_bounds = array<i64: 1, 256>}, {pipeline_mode = #tpu.pipeline_mode<synchronous>, transform_indices = @transform_4, window_bounds = array<i64: 256, 128>}, {pipeline_mode = #tpu.pipeline_mode<synchronous>, transform_indices = @transform_5, window_bounds = array<i64: 1, 128>}, {transform_indices = @transform_6, window_bounds = array<i64: 40, 128>}]} {
    %c0 = arith.constant 0 : index
    %c0_0 = arith.constant 0 : index
    %0 = vector.load %arg1[%c0, %c0_0] : memref<40x40xf32, #tpu.memory_space<vmem>>, vector<40x40xf32>
    %c0_1 = arith.constant 0 : index
    %c0_2 = arith.constant 0 : index
    %1 = vector.load %arg2[%c0_1, %c0_2] : memref<40x256xf32, #tpu.memory_space<vmem>>, vector<40x256xf32>
    %cst = arith.constant dense<0.000000e+00> : vector<40x256xf32>
    %2 = tpu.matmul %0, %1, %cst {dimension_numbers = #tpu.dot_dimension_numbers<[1], [0], [0], [1], [0, 0, 1, 1], [], []>} : vector<40x40xf32>, vector<40x256xf32>, vector<40x256xf32> -> vector<40x256xf32>
    %c0_3 = arith.constant 0 : index
    %c0_4 = arith.constant 0 : index
    %3 = vector.load %arg3[%c0_3, %c0_4] : memref<1x256xf32, #tpu.memory_space<vmem>>, vector<1x256xf32>
    %4 = vector.broadcast %3 : vector<1x256xf32> to vector<40x256xf32>
    %5 = arith.mulf %2, %4 : vector<40x256xf32>
    %c0_5 = arith.constant 0 : index
    %c0_6 = arith.constant 0 : index
    %6 = vector.load %arg4[%c0_5, %c0_6] : memref<1x256xf32, #tpu.memory_space<vmem>>, vector<1x256xf32>
    %7 = vector.broadcast %6 : vector<1x256xf32> to vector<40x256xf32>
    %8 = arith.addf %5, %7 : vector<40x256xf32>
    %cst_7 = arith.constant 0.000000e+00 : f32
    %9 = vector.broadcast %cst_7 : f32 to vector<40x256xf32>
    %10 = arith.maximumf %8, %9 : vector<40x256xf32>
    %c0_8 = arith.constant 0 : index
    %c0_9 = arith.constant 0 : index
    %11 = vector.load %arg5[%c0_8, %c0_9] : memref<256x128xf32, #tpu.memory_space<vmem>>, vector<256x128xf32>
    %cst_10 = arith.constant dense<0.000000e+00> : vector<40x128xf32>
    %12 = tpu.matmul %10, %11, %cst_10 {dimension_numbers = #tpu.dot_dimension_numbers<[1], [0], [0], [1], [0, 0, 1, 1], [], []>} : vector<40x256xf32>, vector<256x128xf32>, vector<40x128xf32> -> vector<40x128xf32>
    %c0_11 = arith.constant 0 : index
    %c0_12 = arith.constant 0 : index
    %13 = vector.load %arg6[%c0_11, %c0_12] : memref<1x128xf32, #tpu.memory_space<vmem>>, vector<1x128xf32>
    %14 = vector.broadcast %13 : vector<1x128xf32> to vector<40x128xf32>
    %15 = arith.addf %12, %14 : vector<40x128xf32>
    %c0_13 = arith.constant 0 : index
    %c0_14 = arith.constant 0 : index
    %16 = vector.load %arg7[%c0_13, %c0_14] : memref<40x128xf32, #tpu.memory_space<vmem>>, vector<40x128xf32>
    tpu.vector_store %arg7[%c0_13, %c0_14], %15 {strides = array<i32>} : memref<40x128xf32, #tpu.memory_space<vmem>>, vector<40x128xf32>,
    return
  }
  func.func @transform_0(%arg0: i32) -> (i32, i32) {
    %c0_i32 = arith.constant 0 : i32
    %c0_i32_0 = arith.constant 0 : i32
    return %arg0, %c0_i32 : i32, i32
  }
  func.func @transform_1(%arg0: i32) -> (i32, i32) {
    %c0_i32 = arith.constant 0 : i32
    %c0_i32_0 = arith.constant 0 : i32
    %c0_i32_1 = arith.constant 0 : i32
    return %c0_i32, %c0_i32_0 : i32, i32
  }
  func.func @transform_2(%arg0: i32) -> (i32, i32) {
    %c0_i32 = arith.constant 0 : i32
    %c0_i32_0 = arith.constant 0 : i32
    %c0_i32_1 = arith.constant 0 : i32
    return %c0_i32, %c0_i32_0 : i32, i32
  }
  func.func @transform_3(%arg0: i32) -> (i32, i32) {
    %c0_i32 = arith.constant 0 : i32
    %c0_i32_0 = arith.constant 0 : i32
    %c0_i32_1 = arith.constant 0 : i32
    return %c0_i32, %c0_i32_0 : i32, i32
  }
  func.func @transform_4(%arg0: i32) -> (i32, i32) {
    %c0_i32 = arith.constant 0 : i32
    %c0_i32_0 = arith.constant 0 : i32
    %c0_i32_1 = arith.constant 0 : i32
    return %c0_i32, %c0_i32_0 : i32, i32
  }
  func.func @transform_5(%arg0: i32) -> (i32, i32) {
    %c0_i32 = arith.constant 0 : i32
    %c0_i32_0 = arith.constant 0 : i32
    %c0_i32_1 = arith.constant 0 : i32
    return %c0_i32, %c0_i32_0 : i32, i32
  }
  func.func @transform_6(%arg0: i32) -> (i32, i32) {
    %c0_i32 = arith.constant 0 : i32
    %c0_i32_0 = arith.constant 0 : i32
    return %arg0, %c0_i32 : i32, i32
  }
}

</mosaic_0001>

<bundles_post_ra>
// kernel: tpu_custom_call.1
= control target key start
LH: loop header
LB: loop body
LE: loop exit
PB: predicated region body
PF: predicated region fallthrough
CT: control target
= control target key end

     0   :  { %11 = vsyncpa [#allocation3], 0  ;;  %s612_s0 = inlined_call_operand.hbm [shape: f32[40,40], index: 0, kind: input, shape index: {}]   ;;  %s613_s1 = inlined_call_operand.hbm [shape: f32[40,256], index: 1, kind: input, shape index: {}]   ;;  %s614_s2 = inlined_call_operand.hbm [shape: f32[1,256], index: 2, kind: input, shape index: {}]   ;;  %s615_s3 = inlined_call_operand.vmem [shape: f32[1,256], index: 3, kind: input, shape index: {}]   ;;  %s616_s4 = inlined_call_operand.hbm [shape: f32[256,128], index: 4, kind: input, shape index: {}]   ;;  %s617_s5 = inlined_call_operand.vmem [shape: f32[1,128], index: 5, kind: input, shape index: {}]   ;;  %s618_s6 = inlined_call_operand.hbm [shape: f32[40,128], index: 6, kind: output, shape index: {}]  }
   0x1   :  { %12 = vsyncpa [#allocation6], 0 }
   0x2   :  { %13 = vsyncpa [#allocation9], 0  ;;  %s32_s23 = sshll.u32 %s613_s1, 4  ;;  %s33_s23 = int_to_ptr.hbm [resolvable:$true] %s32_s23 }
   0x3   :  { %14 = vsyncpa [#allocation4], 0  ;;  %s528_s24 = smov [#allocation5]   ;;  %s19_s28 = sshll.u32 %s612_s0, 4  ;;  %s20_s28 = int_to_ptr.hbm [resolvable:$true] %s19_s28 }
   0x4   :  { %s34_s25 = sshll.u32 %s528_s24, 4  ;;  %s529_s29 = smov 256   ;;  %s35_s25 = int_to_ptr.vmem [resolvable:$true] %s34_s25 }
   0x5   :  { %s530_s30 = smov 16   ;;  %s531_s7 = smov [#allocation2]  }
   0x6   :  { %40 = dma.hbm_to_vmem [thread:$0]  %s33_s23, 1280, %s35_s25, [#allocation6], %s529_s29, %s529_s29, %s530_s30  }
   0x7   :  { %s21_s8 = sshll.u32 %s531_s7, 4  ;;  %s532_s9 = smov 128   ;;  %s22_s8 = int_to_ptr.vmem [resolvable:$true] %s21_s8 }
   0x8   :  { %s533_s10 = smov 8   ;;  %s46_s12 = sshll.u32 %s614_s2, 4  ;;  %s47_s12 = int_to_ptr.hbm [resolvable:$true] %s46_s12 }
   0x9   :  { %27 = dma.hbm_to_vmem [thread:$0]  %s20_s28, 640, %s22_s8, [#allocation3], %s532_s9, %s532_s9, %s533_s10  }
   0xa   :  { %s534_s13 = smov [#allocation7]   ;;  %s58_s16 = sshll.u32 %s616_s4, 4  ;;  %s59_s16 = int_to_ptr.hbm [resolvable:$true] %s58_s16 }
   0xb   :  { %s48_s0 = sshll.u32 %s534_s13, 4  ;;  %s535_s17 = smov [#allocation8]   ;;  %s49_s0 = int_to_ptr.vmem [resolvable:$true] %s48_s0 }
   0xc   :  { %51 = dma.hbm_to_vmem [thread:$0]  %s47_s12, 32, %s49_s0, [#allocation6]  }
   0xd   :  { %s60_s18 = sshll.u32 %s535_s17, 4  ;;  %s61_s18 = int_to_ptr.vmem [resolvable:$true] %s60_s18 }
   0xe   :  { %66 = dma.hbm_to_vmem [thread:$0]  %s59_s16, 4096, %s61_s18, [#allocation9], %s532_s9, %s532_s9, %s533_s10  }
   0xf   :  { %520 = dma.done.wait [#allocation3], 640  }
  0x10   :  { %521 = vsyncadd [#allocation3], 4294966656 }
  0x11   :  { %522 = dma.done.wait [#allocation6], 1312  }
  0x12   :  { %523 = vsyncadd [#allocation6], 4294965984 }
  0x13   :  { %524 = dma.done.wait [#allocation9], 4096  }
  0x14   :  { %525 = vsyncadd [#allocation9], 4294963200  ;;  %v98_v0 = vld [vmem:[#allocation5 + $0x40] sm:$0xff]  ;;  %v96_v1 = vld [vmem:[#allocation5 + $0x30] sm:$0xff]  ;;  %vm100_vm0 = vcmask 326656   ;;  %s333_s23 = sshll.u32 %s618_s6, 4  ;;  %s334_s23 = int_to_ptr.hbm [resolvable:$true] %s333_s23 }
  0x15   :  { %v99_v2 = vld [vmem:[#allocation5 + $0x48] sm:$0xff]  ;;  %127 = vmatpush.msra.mxu0 %v98_v0  ;;  %v97_v3 = vld [vmem:[#allocation5 + $0x38] sm:$0xff]  ;;  %v94_v4 = vld [vmem:[#allocation5 + $0x20] sm:$0xff] }
  0x16   :  { %159 = vmatpush.msra.mxu1 %v99_v2  ;;  %v95_v5 = vld [vmem:[#allocation5 + $0x28] sm:$0xff]  ;;  %v92_v6 = vld [vmem:[#allocation5 + $0x10] sm:$0xff]  ;;  %v93_v7 = vld [vmem:[#allocation5 + $0x18] sm:$0xff] }
  0x17   :  { %128 = vmatpush.msra.mxu0 %v96_v1  ;;  %v90_v8 = vld [vmem:[#allocation5] sm:$0xff]  ;;  %v91_v9 = vld [vmem:[#allocation5 + $0x8] sm:$0xff]  ;;  %v85_v10 = vld [vmem:[#allocation2] sm:$0xff] }
  0x18   :  { %160 = vmatpush.msra.mxu1 %v97_v3  ;;  %v237_v11 = vld [vmem:[#allocation8 + $0x78] sm:$0xff]  ;;  %v236_v12 = vld [vmem:[#allocation8 + $0x70] sm:$0xff]  ;;  %v235_v15 = vld [vmem:[#allocation8 + $0x68] sm:$0xff] }
  0x19   :  { %129 = vmatpush.msra.mxu0 %v94_v4  ;;  %v253_v13 = vld [vmem:[#allocation8 + $0xf8] sm:$0xff]  ;;  %v252_v14 = vld [vmem:[#allocation8 + $0xf0] sm:$0xff]  ;;  %v251_v16 = vld [vmem:[#allocation8 + $0xe8] sm:$0xff]  ;;  %358 = vmatpush.msra.mxu2 %v237_v11 }
  0x1a   :  { %161 = vmatpush.msra.mxu1 %v95_v5  ;;  %374 = vmatpush.msra.mxu3 %v253_v13  ;;  %v234_v17 = vld [vmem:[#allocation8 + $0x60] sm:$0xff]  ;;  %v86_v19 = vld [vmem:[#allocation2 + $0x8] sm:$0xff]  ;;  %v233_v20 = vld [vmem:[#allocation8 + $0x58] sm:$0xff] }
  0x1b   :  { %130 = vmatpush.msra.mxu0 %v92_v6  ;;  %v250_v18 = vld [vmem:[#allocation8 + $0xe0] sm:$0xff]  ;;  %359 = vmatpush.msra.mxu2 %v236_v12  ;;  %v249_v21 = vld [vmem:[#allocation8 + $0xd8] sm:$0xff]  ;;  %v232_v22 = vld [vmem:[#allocation8 + $0x50] sm:$0xff] }
  0x1c   :  { %162 = vmatpush.msra.mxu1 %v93_v7  ;;  %375 = vmatpush.msra.mxu3 %v252_v14  ;;  %v248_v23 = vld [vmem:[#allocation8 + $0xd0] sm:$0xff]  ;;  %v231_v24 = vld [vmem:[#allocation8 + $0x48] sm:$0xff]  ;;  %v230_v26 = vld [vmem:[#allocation8 + $0x40] sm:$0xff] }
  0x1d   :  { %131 = vmatpush.msra.mxu0 %v90_v8  ;;  %360 = vmatpush.msra.mxu2 %v235_v15  ;;  %v247_v25 = vld [vmem:[#allocation8 + $0xc8] sm:$0xff]  ;;  %v246_v27 = vld [vmem:[#allocation8 + $0xc0] sm:$0xff]  ;;  %v87_v28 = vld [vmem:[#allocation2 + $0x10] sm:$0xff] }
  0x1e   :  { %163 = vmatpush.msra.mxu1 %v91_v9  ;;  %348 = vmatmul.msk.f32.vlgmr.msra.gmra.mxu0 %vm100_vm0, %v85_v10  ;;  %v229_v29 = vld [vmem:[#allocation8 + $0x38] sm:$0xff]  ;;  %v228_v31 = vld [vmem:[#allocation8 + $0x30] sm:$0xff]  ;;  %v227_v33 = vld [vmem:[#allocation8 + $0x28] sm:$0xff] }
  0x1f   :  { %353 = vmatmul.msk.f32.vlgmr.msra.gmra.mxu1 %vm100_vm0, %v85_v10  ;;  %258 = vmatpush.msrb.mxu0 %v237_v11  ;;  %v245_v30 = vld [vmem:[#allocation8 + $0xb8] sm:$0xff]  ;;  %v244_v32 = vld [vmem:[#allocation8 + $0xb0] sm:$0xff]  ;;  %v243_v34 = vld [vmem:[#allocation8 + $0xa8] sm:$0xff] }
  0x20   :  { %290 = vmatpush.msrb.mxu1 %v253_v13  ;;  %376 = vmatpush.msra.mxu3 %v251_v16  ;;  %v226_v35 = vld [vmem:[#allocation8 + $0x20] sm:$0xff]  ;;  %v225_v38 = vld [vmem:[#allocation8 + $0x18] sm:$0xff]  ;;  %v224_v40 = vld [vmem:[#allocation8 + $0x10] sm:$0xff] }
  0x21   :  { %259 = vmatpush.msrb.mxu0 %v236_v12  ;;  %361 = vmatpush.msra.mxu2 %v234_v17  ;;  %v88_v36 = vld [vmem:[#allocation2 + $0x18] sm:$0xff]  ;;  %v89_v37 = vld [vmem:[#allocation2 + $0x20] sm:$0xff]  ;;  %v240_v43 = vld [vmem:[#allocation8 + $0x90] sm:$0xff] }
  0x22   :  { %291 = vmatpush.msrb.mxu1 %v252_v14  ;;  %377 = vmatpush.msra.mxu3 %v250_v18  ;;  %v242_v39 = vld [vmem:[#allocation8 + $0xa0] sm:$0xff]  ;;  %v241_v41 = vld [vmem:[#allocation8 + $0x98] sm:$0xff]  ;;  %v223_v42 = vld [vmem:[#allocation8 + $0x8] sm:$0xff] }
  0x23   :  { %260 = vmatpush.msrb.mxu0 %v235_v15  ;;  %362 = vmatpush.msra.mxu2 %v233_v20  ;;  %v222_v44 = vld [vmem:[#allocation8] sm:$0xff]  ;;  %v239_v45 = vld [vmem:[#allocation8 + $0x88] sm:$0xff]  ;;  %v180_v47 = vld [vmem:[#allocation7] sm:$0x3] }
  0x24   :  { %292 = vmatpush.msrb.mxu1 %v251_v16  ;;  %378 = vmatpush.msra.mxu3 %v249_v21  ;;  %v238_v46 = vld [vmem:[#allocation8 + $0x80] sm:$0xff]  ;;  %v182_v49 = vperm.slane %v180_v47, 0  ;;  %v183_v50 = vperm.slane %v180_v47, 1 }
  0x25   :  { %261 = vmatpush.msrb.mxu0 %v234_v17  ;;  %363 = vmatpush.msra.mxu2 %v232_v22  ;;  %v196_v48 = vld [vmem:[%s615_s3] sm:$0x3] }
  0x26   :  { %293 = vmatpush.msrb.mxu1 %v250_v18  ;;  %349 = vmatmul.msk.f32.gmra.mxu0 %vm100_vm0, %v86_v19  ;;  %v198_v51 = vperm.slane %v196_v48, 0  ;;  %v199_v52 = vperm.slane %v196_v48, 1 }
  0x27   :  { %354 = vmatmul.msk.f32.gmra.mxu1 %vm100_vm0, %v86_v19  ;;  %262 = vmatpush.msrb.mxu0 %v233_v20 }
  0x28   :  { %294 = vmatpush.msrb.mxu1 %v249_v21  ;;  %379 = vmatpush.msra.mxu3 %v248_v23 }
  0x29   :  { %263 = vmatpush.msrb.mxu0 %v232_v22  ;;  %364 = vmatpush.msra.mxu2 %v231_v24 }
  0x2a   :  { %295 = vmatpush.msrb.mxu1 %v248_v23  ;;  %380 = vmatpush.msra.mxu3 %v247_v25 }
  0x2b   :  { %264 = vmatpush.msrb.mxu0 %v231_v24  ;;  %365 = vmatpush.msra.mxu2 %v230_v26 }
  0x2c   :  { %296 = vmatpush.msrb.mxu1 %v247_v25  ;;  %381 = vmatpush.msra.mxu3 %v246_v27 }
  0x2d   :  { %265 = vmatpush.msrb.mxu0 %v230_v26  ;;  %366 = vmatpush.msra.mxu2 %v229_v29 }
  0x2e   :  { %297 = vmatpush.msrb.mxu1 %v246_v27  ;;  %350 = vmatmul.msk.f32.gmra.mxu0 %vm100_vm0, %v87_v28 }
  0x2f   :  { %355 = vmatmul.msk.f32.gmra.mxu1 %vm100_vm0, %v87_v28  ;;  %266 = vmatpush.msrb.mxu0 %v229_v29  ;;  %v399_v29 = vld [vmem:[%s617_s5] ss:$0 sm:$0xff]  ;;  %s536_s5 = smov [#allocation10]  }
  0x30   :  { %298 = vmatpush.msrb.mxu1 %v245_v30  ;;  %382 = vmatpush.msra.mxu3 %v245_v30  ;;  %s331_s20 = sshll.u32 %s536_s5, 4  ;;  %s332_s20 = int_to_ptr.vmem [resolvable:$true] %s331_s20 }
  0x31   :  { %267 = vmatpush.msrb.mxu0 %v228_v31  ;;  %367 = vmatpush.msra.mxu2 %v228_v31 }
  0x32   :  { %299 = vmatpush.msrb.mxu1 %v244_v32  ;;  %383 = vmatpush.msra.mxu3 %v244_v32 }
  0x33   :  { %268 = vmatpush.msrb.mxu0 %v227_v33  ;;  %368 = vmatpush.msra.mxu2 %v227_v33 }
  0x34   :  { %300 = vmatpush.msrb.mxu1 %v243_v34  ;;  %384 = vmatpush.msra.mxu3 %v243_v34 }
  0x35   :  { %269 = vmatpush.msrb.mxu0 %v226_v35  ;;  %369 = vmatpush.msra.mxu2 %v226_v35 }
  0x36   :  { %351 = vmatmul.msk.f32.gmra.mxu0 %vm100_vm0, %v88_v36  ;;  %301 = vmatpush.msrb.mxu1 %v242_v39 }
  0x37   :  { %356 = vmatmul.msk.f32.gmra.mxu1 %vm100_vm0, %v88_v36  ;;  %270 = vmatpush.msrb.mxu0 %v225_v38 }
  0x38   :  { %370 = vmatpush.msra.mxu2 %v225_v38  ;;  %385 = vmatpush.msra.mxu3 %v242_v39 }
  0x39   :  { %271 = vmatpush.msrb.mxu0 %v224_v40  ;;  %302 = vmatpush.msrb.mxu1 %v241_v41 }
  0x3a   :  { %371 = vmatpush.msra.mxu2 %v224_v40  ;;  %386 = vmatpush.msra.mxu3 %v241_v41 }
  0x3b   :  { %272 = vmatpush.msrb.mxu0 %v223_v42  ;;  %303 = vmatpush.msrb.mxu1 %v240_v43 }
  0x3c   :  { %372 = vmatpush.msra.mxu2 %v223_v42  ;;  %387 = vmatpush.msra.mxu3 %v240_v43 }
  0x3d   :  { %273 = vmatpush.msrb.mxu0 %v222_v44  ;;  %304 = vmatpush.msrb.mxu1 %v239_v45 }
  0x3e   :  { %352 = vmatmul.msk.f32.gmra.mxu0 %vm100_vm0, %v89_v37  ;;  %373 = vmatpush.msra.mxu2 %v222_v44 }
  0x3f   :  { %357 = vmatmul.msk.f32.gmra.mxu1 %vm100_vm0, %v89_v37  ;;  %388 = vmatpush.msra.mxu3 %v239_v45 }
  0x40   :  { %305 = vmatpush.msrb.mxu1 %v238_v46 }
  0x41   :  { %389 = vmatpush.msra.mxu3 %v238_v46 }
  0x9b   :  { %v133_v53 = vpop.f32.mrf.mxu0 }
  0x9c   :  { %v165_v54 = vpop.f32.mrf.mxu1  ;;  %v186_v55 = vmul.f32 %v182_v49, %v133_v53 }
  0x9d   :  { %v187_v56 = vmul.f32 %v183_v50, %v165_v54 }
  0x9e   :  { %v202_v57 = vadd.f32 %v198_v51, %v186_v55 }
  0x9f   :  { %v203_v58 = vadd.f32 %v199_v52, %v187_v56 }
  0xa0   :  { %v212_v59 = vmax.f32 %v202_v57, 0.0 }
  0xa1   :  { %v213_v60 = vmax.f32 %v203_v58, 0.0 }
  0xa2   :  { %274 = vmatmul.f32.vlgmr.msrb.gmra.mxu0 %v212_v59 }
  0xa3   :  { %306 = vmatmul.f32.vlgmr.msrb.gmra.mxu1 %v213_v60  ;;  %v136_v61 = vpop.f32.mrf.mxu0 }
  0xa4   :  { %v168_v62 = vpop.f32.mrf.mxu1  ;;  %v188_v63 = vmul.f32 %v182_v49, %v136_v61 }
  0xa5   :  { %v189_v0 = vmul.f32 %v183_v50, %v168_v62 }
  0xa6   :  { %v204_v1 = vadd.f32 %v198_v51, %v188_v63 }
  0xa7   :  { %v205_v2 = vadd.f32 %v199_v52, %v189_v0 }
  0xa8   :  { %v214_v3 = vmax.f32 %v204_v1, 0.0 }
  0xa9   :  { %v215_v4 = vmax.f32 %v205_v2, 0.0 }
  0xaa   :  { %277 = vmatmul.f32.vlgmr.msra.gmra.mxu2 %v214_v3 }
  0xab   :  { %309 = vmatmul.f32.vlgmr.msra.gmra.mxu3 %v215_v4  ;;  %v139_v5 = vpop.f32.mrf.mxu0 }
  0xac   :  { %v171_v6 = vpop.f32.mrf.mxu1  ;;  %v190_v7 = vmul.f32 %v182_v49, %v139_v5 }
  0xad   :  { %v191_v8 = vmul.f32 %v183_v50, %v171_v6 }
  0xae   :  { %v206_v9 = vadd.f32 %v198_v51, %v190_v7 }
  0xaf   :  { %v207_v10 = vadd.f32 %v199_v52, %v191_v8 }
  0xb0   :  { %v216_v11 = vmax.f32 %v206_v9, 0.0 }
  0xb1   :  { %v217_v12 = vmax.f32 %v207_v10, 0.0 }
  0xb2   :  { %280 = vmatmul.f32.gmra.mxu2 %v216_v11 }
  0xb3   :  { %312 = vmatmul.f32.gmra.mxu3 %v217_v12  ;;  %v142_v13 = vpop.f32.mrf.mxu0 }
  0xb4   :  { %v174_v14 = vpop.f32.mrf.mxu1  ;;  %v192_v15 = vmul.f32 %v182_v49, %v142_v13 }
  0xb5   :  { %v193_v16 = vmul.f32 %v183_v50, %v174_v14 }
  0xb6   :  { %v208_v17 = vadd.f32 %v198_v51, %v192_v15 }
  0xb7   :  { %v209_v18 = vadd.f32 %v199_v52, %v193_v16 }
  0xb8   :  { %v218_v19 = vmax.f32 %v208_v17, 0.0 }
  0xb9   :  { %v219_v20 = vmax.f32 %v209_v18, 0.0 }
  0xba   :  { %283 = vmatmul.f32.gmra.mxu2 %v218_v19 }
  0xbb   :  { %315 = vmatmul.f32.gmra.mxu3 %v219_v20  ;;  %v145_v21 = vpop.f32.mrf.mxu0 }
  0xbc   :  { %v177_v22 = vpop.f32.mrf.mxu1  ;;  %v194_v23 = vmul.f32 %v182_v49, %v145_v21 }
  0xbd   :  { %v195_v24 = vmul.f32 %v183_v50, %v177_v22 }
  0xbe   :  { %v210_v25 = vadd.f32 %v198_v51, %v194_v23 }
  0xbf   :  { %v211_v26 = vadd.f32 %v199_v52, %v195_v24 }
  0xc0   :  { %v220_v27 = vmax.f32 %v210_v25, 0.0 }
  0xc1   :  { %v221_v28 = vmax.f32 %v211_v26, 0.0 }
  0xc2   :  { %286 = vmatmul.f32.gmra.mxu2 %v220_v27 }
  0xc3   :  { %318 = vmatmul.f32.gmra.mxu3 %v221_v28 }
 0x11f   :  { %v275_v30 = vpop.f32.mrf.mxu0 }
 0x120   :  { %v307_v31 = vpop.f32.mrf.mxu1  ;;  %v276_v32 = vadd.f32 %v399_v29, %v275_v30 }
 0x122   :  { %v308_v33 = vadd.f32 %v307_v31, %v276_v32 }
 0x124   :  { %322 = vst [vmem:[#allocation10] sm:$0xff] %v308_v33 }
 0x12d   :  { %v278_v34 = vpop.f32.mrf.mxu2 }
 0x12e   :  { %v310_v35 = vpop.f32.mrf.mxu3  ;;  %v279_v36 = vadd.f32 %v399_v29, %v278_v34 }
 0x130   :  { %v311_v37 = vadd.f32 %v310_v35, %v279_v36 }
 0x132   :  { %323 = vst [vmem:[#allocation10 + $0x8] sm:$0xff] %v311_v37 }
 0x135   :  { %v281_v38 = vpop.f32.mrf.mxu2 }
 0x136   :  { %v313_v39 = vpop.f32.mrf.mxu3  ;;  %v282_v40 = vadd.f32 %v399_v29, %v281_v38 }
 0x138   :  { %v314_v41 = vadd.f32 %v313_v39, %v282_v40 }
 0x13a   :  { %324 = vst [vmem:[#allocation10 + $0x10] sm:$0xff] %v314_v41 }
 0x13d   :  { %v284_v42 = vpop.f32.mrf.mxu2 }
 0x13e   :  { %v316_v43 = vpop.f32.mrf.mxu3  ;;  %v285_v44 = vadd.f32 %v399_v29, %v284_v42 }
 0x140   :  { %v317_v45 = vadd.f32 %v316_v43, %v285_v44 }
 0x142   :  { %325 = vst [vmem:[#allocation10 + $0x18] sm:$0xff] %v317_v45 }
 0x145   :  { %v287_v46 = vpop.f32.mrf.mxu2 }
 0x146   :  { %v319_v47 = vpop.f32.mrf.mxu3  ;;  %v288_v48 = vadd.f32 %v399_v29, %v287_v46 }
 0x148   :  { %v320_v49 = vadd.f32 %v319_v47, %v288_v48 }
 0x14a   :  { %326 = vst [vmem:[#allocation10 + $0x20] sm:$0xff] %v320_v49 }
 0x14b   :  { %339 = dma.vmem_to_hbm [thread:$0]  %s332_s20, 640, %s334_s23, [#allocation4], %s532_s9, %s532_s9, %s533_s10  }
 0x14c   :  { %526 = dma.done.wait [#allocation4], 640  }
 0x14d   :  { %527 = vsyncadd [#allocation4], 4294966656 }
 0x14e   :  { %344 = vsyncpa [#allocation3], 1 }
 0x14f   :  { %345 = vsyncpa [#allocation6], 1 }
 0x150   :  { %346 = vsyncpa [#allocation9], 1 }
 0x151   :  { %347 = vsyncpa [#allocation4], 1 }

</bundles_post_ra>
